<compile_context>
chip_gen: v7x
topology: tpu7x:2x2x1
jax: 0.10.0
libtpu: 0.0.40
codegen_flags: <defaults>
</compile_context>

<pallas_src>
import functools

import jax
import jax.numpy as jnp
from jax.experimental import pallas as pl
from jax.experimental.pallas import tpu as pltpu


# ---------------------------------------------------------------------------
# Kernels
# ---------------------------------------------------------------------------
def _norm_kernel(x_ref, alpha_ref, bias_ref, o_ref, *, eps, d_model):
    """General path: one block = (tile_rows, d_model), normalize each row."""
    x = x_ref[...].astype(jnp.float32)            # (tile, d)
    alpha = alpha_ref[...].astype(jnp.float32)    # (1, d)
    bias = bias_ref[...].astype(jnp.float32)      # (1, d)

    # One-pass stats: sum(x) and sum(x*x); no full-tile `centered` temp is live
    # across the reductions (fewer VPU passes, lower vreg/VMEM pressure).
    s = jnp.sum(x, axis=-1, keepdims=True)        # (tile, 1)
    sq = jnp.sum(x * x, axis=-1, keepdims=True)   # (tile, 1)
    mean = s * (1.0 / d_model)
    # Unbiased variance (N-1 divisor) matches torch.Tensor.std default.
    # TODO(synk): torch gives NaN for d_model == 1; we clamp the divisor instead.
    var = jnp.maximum(sq - s * mean, 0.0) * (1.0 / max(d_model - 1, 1))
    # approx=False keeps exact numerics vs. the torch reference; this only
    # touches a (tile, 1) slab so approx=True would be a micro-win at best.
    inv = pl.reciprocal(jnp.sqrt(var) + eps, approx=False)
    o_ref[...] = ((x - mean) * inv * alpha + bias).astype(o_ref.dtype)


def _norm_folded_kernel(x_ref, alpha_ref, bias_ref, seg_ref, segt_ref, o_ref,
                        *, eps, d_model):
    """Lane-dense path for d_model < 128: g = L // d_model original rows folded
    into one 128-lane row; segmented reductions done on the (idle) MXU."""
    x = x_ref[...].astype(jnp.float32)            # (tile, L)
    alpha = alpha_ref[...].astype(jnp.float32)    # (1, L)   alpha tiled g times
    bias = bias_ref[...].astype(jnp.float32)      # (1, L)
    seg = seg_ref[...]                            # (L, g)  0/1 segment-sum matrix
    segt = segt_ref[...]                          # (g, L)  = seg.T

    hi = jax.lax.Precision.HIGHEST                # keep f32-exact segment sums
    s = jnp.dot(x, seg, precision=hi, preferred_element_type=jnp.float32)
    sq = jnp.dot(x * x, seg, precision=hi, preferred_element_type=jnp.float32)
    mean = s * (1.0 / d_model)                    # (tile, g)
    var = jnp.maximum(sq - s * mean, 0.0) * (1.0 / max(d_model - 1, 1))
    inv = pl.reciprocal(jnp.sqrt(var) + eps, approx=False)
    # Broadcast per-segment stats back to lane-dense (tile, L) via the MXU
    # (one nonzero per output lane => exact).
    mean_b = jnp.dot(mean, segt, precision=hi, preferred_element_type=jnp.float32)
    inv_b = jnp.dot(inv, segt, precision=hi, preferred_element_type=jnp.float32)
    o_ref[...] = ((x - mean_b) * inv_b * alpha + bias).astype(o_ref.dtype)


# ---------------------------------------------------------------------------
# Wrapper helpers
# ---------------------------------------------------------------------------
def _chip_budgets():
    """Returns (per-step VMEM budget, vmem_limit_bytes, tensorcores_per_chip)."""
    vmem_cap = None
    n_cores = 1
    try:
        info = pltpu.get_tpu_info()
        vmem_cap = getattr(info, "vmem_capacity_bytes", None)
        for attr in ("num_cores", "tensor_cores_per_chip", "cores_per_chip"):
            v = getattr(info, attr, None)
            if isinstance(v, int) and v > 0:
                n_cores = v
                break
    except Exception:
        pass
    if n_cores == 1:
        try:
            if "v7" in jax.devices()[0].device_kind.lower():
                n_cores = 2
        except Exception:
            pass
    if vmem_cap is not None and vmem_cap >= 100 * 1024 * 1024:
        # v5e/v6e class (128 MiB VMEM): big blocks amortize the ~600-cycle
        # per-grid-step cost; total per-step footprint stays well under 64 MiB.
        return 24 << 20, 64 * 1024 * 1024, n_cores
    # v7x class (64 MiB VMEM / TC) or unknown: conservative budget/limit.
    return 12 << 20, 32 * 1024 * 1024, n_cores


def _pick_row_tile(nrows, row_bytes, sublane, vmem_budget, n_cores,
                   max_row_tile=8192):
    """Largest sublane-aligned row tile whose total per-step VMEM footprint
    (double-buffered I/O + f32 temps, = row_bytes per row) fits the budget.
    No padding is ever required: a partial last grid block is masked."""
    tile = (vmem_budget // max(row_bytes, 1)) // sublane * sublane
    tile = max(sublane, min(tile, max_row_tile))
    if tile >= nrows:
        tile = nrows                      # single full block (always legal)
    if n_cores >= 2 and nrows >= n_cores * sublane:
        # v7x megacore: make the step count a multiple of the core count so
        # neither TensorCore idles or gets a straggler step.
        steps = -(-nrows // tile)
        if steps % n_cores != 0:
            steps = -(-steps // n_cores) * n_cores
            per_step = -(-nrows // steps)
            tile = -(-per_step // sublane) * sublane
    return tile


def _call_norm(kernel, inputs, in_specs, out_rows, out_cols, tile, dtype,
               vmem_limit):
    grid = (pl.cdiv(out_rows, tile),)
    return pl.pallas_call(
        kernel,
        out_shape=jax.ShapeDtypeStruct((out_rows, out_cols), dtype),
        grid_spec=pltpu.PrefetchScalarGridSpec(
            num_scalar_prefetch=0,
            grid=grid,
            in_specs=in_specs,
            out_specs=pl.BlockSpec((tile, out_cols), lambda i: (i, 0)),
        ),
        compiler_params=pltpu.CompilerParams(
            dimension_semantics=("parallel",),
            vmem_limit_bytes=vmem_limit,
        ),
    )(*inputs)


# ---------------------------------------------------------------------------
# Public entry point
# ---------------------------------------------------------------------------
def norm(x, alpha, bias, eps=1e-6):
    """alpha * (x - mean) / (std_unbiased + eps) + bias over the last axis.

    x: (..., d_model); alpha, bias: (d_model,)
    """
    orig_shape = x.shape
    d_model = orig_shape[-1]
    x2d = x.reshape(-1, d_model)
    rows = x2d.shape[0]

    itemsize = jnp.dtype(x.dtype).itemsize
    # Sublane packing per dtype: 8 rows (f32), 16 (bf16), 32 (int8/fp8).
    sublane = max(8, 32 // max(itemsize, 1))
    vmem_budget, vmem_limit, n_cores = _chip_budgets()
    # Per-row VMEM footprint: double-buffered in+out blocks + ~2 f32 temps.
    row_cost = 2 * (itemsize + itemsize) + 2 * 4

    # Lane-dense folding for narrow d_model (fills all 128 lanes, unmasked vst).
    g = 1
    if 2 <= d_model < 128 and 128 % d_model == 0 and rows % (128 // d_model) == 0:
        g = 128 // d_model

    if g > 1:
        try:
            lanes = g * d_model
            nrows = rows // g
            xf = x2d.reshape(nrows, lanes)            # free row-major view
            alpha_f = jnp.tile(alpha.reshape(-1), g).reshape(1, lanes)
            bias_f = jnp.tile(bias.reshape(-1), g).reshape(1, lanes)
            lane_seg = jnp.arange(lanes, dtype=jnp.int32) // d_model
            seg = (lane_seg[:, None] == jnp.arange(g, dtype=jnp.int32)[None, :]
                   ).astype(jnp.float32)              # (lanes, g)
            segt = jnp.transpose(seg)                 # (g, lanes)

            tile = _pick_row_tile(nrows, lanes * row_cost, sublane,
                                  vmem_budget, n_cores)
            kernel = functools.partial(_norm_folded_kernel, eps=eps,
                                       d_model=d_model)
            in_specs = [
                pl.BlockSpec((tile, lanes), lambda i: (i, 0)),
                pl.BlockSpec((1, lanes), lambda i: (0, 0)),
                pl.BlockSpec((1, lanes), lambda i: (0, 0)),
                pl.BlockSpec((lanes, g), lambda i: (0, 0)),
                pl.BlockSpec((g, lanes), lambda i: (0, 0)),
            ]
            out = _call_norm(kernel, (xf, alpha_f, bias_f, seg, segt),
                             in_specs, nrows, lanes, tile, x.dtype, vmem_limit)
            return out.reshape(orig_shape)
        except Exception:
            # Defensive: if the MXU-segmented variant fails to lower on this
            # jax/libtpu build, fall back to the always-correct general path.
            pass

    # General per-row path: (tile, d_model) blocks, partial last block masked.
    alpha2d = alpha.reshape(1, d_model)
    bias2d = bias.reshape(1, d_model)
    tile = _pick_row_tile(rows, d_model * row_cost, sublane,
                          vmem_budget, n_cores)
    kernel = functools.partial(_norm_kernel, eps=eps, d_model=d_model)
    in_specs = [
        pl.BlockSpec((tile, d_model), lambda i: (i, 0)),
        pl.BlockSpec((1, d_model), lambda i: (0, 0)),
        pl.BlockSpec((1, d_model), lambda i: (0, 0)),
    ]
    out = _call_norm(kernel, (x2d, alpha2d, bias2d), in_specs,
                     rows, d_model, tile, x.dtype, vmem_limit)
    return out.reshape(orig_shape)


if __name__ == "__main__":
    batch, seq, d_model = 2, 16, 32
    key = jax.random.PRNGKey(0)
    x = jax.random.normal(key, (batch, seq, d_model), dtype=jnp.float32)

    # Deterministic parameter init matching nn.Parameter(torch.ones/zeros(d_model))
    alpha = jnp.ones((d_model,), dtype=jnp.float32)
    bias = jnp.zeros((d_model,), dtype=jnp.float32)

    out = norm(x, alpha, bias, eps=1e-6)
    jax.block_until_ready(out)

    # Reference in plain JAX (unbiased std, like torch.Tensor.std default).
    mean = jnp.mean(x, axis=-1, keepdims=True)
    std = jnp.sqrt(jnp.sum((x - mean) ** 2, axis=-1, keepdims=True) / (d_model - 1))
    ref = alpha * (x - mean) / (std + 1e-6) + bias
    assert jnp.allclose(out, ref, atol=1e-5, rtol=1e-5)

    print("KERNEL_OK")
</pallas_src>

<mosaic_0001>
module attributes {stable_mosaic.version = 11 : i64} {
  func.func @_norm_folded_kernel(%arg0: i32, %arg1: memref<8x128xf32, #tpu.memory_space<vmem>>, %arg2: memref<1x128xf32, #tpu.memory_space<vmem>>, %arg3: memref<1x128xf32, #tpu.memory_space<vmem>>, %arg4: memref<128x4xf32, #tpu.memory_space<vmem>>, %arg5: memref<4x128xf32, #tpu.memory_space<vmem>>, %arg6: memref<8x128xf32, #tpu.memory_space<vmem>>) attributes {dimension_semantics = [#tpu.dimension_semantics<parallel>], iteration_bounds = array<i64: 1>, scalar_prefetch = 0 : i64, scratch_operands = 0 : i64, tpu.core_type = #tpu.core_type<tc>, window_params = [{transform_indices = @transform_0, window_bounds = array<i64: 8, 128>}, {pipeline_mode = #tpu.pipeline_mode<synchronous>, transform_indices = @transform_1, window_bounds = array<i64: 1, 128>}, {pipeline_mode = #tpu.pipeline_mode<synchronous>, transform_indices = @transform_2, window_bounds = array<i64: 1, 128>}, {pipeline_mode = #tpu.pipeline_mode<synchronous>, transform_indices = @transform_3, window_bounds = array<i64: 128, 4>}, {pipeline_mode = #tpu.pipeline_mode<synchronous>, transform_indices = @transform_4, window_bounds = array<i64: 4, 128>}, {transform_indices = @transform_5, window_bounds = array<i64: 8, 128>}]} {
    %c0 = arith.constant 0 : index
    %c0_0 = arith.constant 0 : index
    %0 = vector.load %arg1[%c0, %c0_0] : memref<8x128xf32, #tpu.memory_space<vmem>>, vector<8x128xf32>
    %c0_1 = arith.constant 0 : index
    %c0_2 = arith.constant 0 : index
    %1 = vector.load %arg2[%c0_1, %c0_2] : memref<1x128xf32, #tpu.memory_space<vmem>>, vector<1x128xf32>
    %c0_3 = arith.constant 0 : index
    %c0_4 = arith.constant 0 : index
    %2 = vector.load %arg3[%c0_3, %c0_4] : memref<1x128xf32, #tpu.memory_space<vmem>>, vector<1x128xf32>
    %c0_5 = arith.constant 0 : index
    %c0_6 = arith.constant 0 : index
    %3 = vector.load %arg4[%c0_5, %c0_6] : memref<128x4xf32, #tpu.memory_space<vmem>>, vector<128x4xf32>
    %c0_7 = arith.constant 0 : index
    %c0_8 = arith.constant 0 : index
    %4 = vector.load %arg5[%c0_7, %c0_8] : memref<4x128xf32, #tpu.memory_space<vmem>>, vector<4x128xf32>
    %cst = arith.constant dense<0.000000e+00> : vector<8x4xf32>
    %5 = tpu.matmul %0, %3, %cst {dimension_numbers = #tpu.dot_dimension_numbers<[1], [0], [0], [1], [0, 0, 1, 1], [], []>, precision = #tpu.contract_precision<fp32>} : vector<8x128xf32>, vector<128x4xf32>, vector<8x4xf32> -> vector<8x4xf32>
    %6 = arith.mulf %0, %0 : vector<8x128xf32>
    %cst_9 = arith.constant dense<0.000000e+00> : vector<8x4xf32>
    %7 = tpu.matmul %6, %3, %cst_9 {dimension_numbers = #tpu.dot_dimension_numbers<[1], [0], [0], [1], [0, 0, 1, 1], [], []>, precision = #tpu.contract_precision<fp32>} : vector<8x128xf32>, vector<128x4xf32>, vector<8x4xf32> -> vector<8x4xf32>
    %cst_10 = arith.constant 3.125000e-02 : f32
    %8 = vector.broadcast %cst_10 : f32 to vector<8x4xf32>
    %9 = arith.mulf %5, %8 : vector<8x4xf32>
    %10 = arith.mulf %5, %9 : vector<8x4xf32>
    %11 = arith.subf %7, %10 : vector<8x4xf32>
    %cst_11 = arith.constant 0.000000e+00 : f32
    %12 = vector.broadcast %cst_11 : f32 to vector<8x4xf32>
    %13 = arith.maximumf %11, %12 : vector<8x4xf32>
    %cst_12 = arith.constant 0.0322580636 : f32
    %14 = vector.broadcast %cst_12 : f32 to vector<8x4xf32>
    %15 = arith.mulf %13, %14 : vector<8x4xf32>
    %16 = math.sqrt %15 : vector<8x4xf32>
    %cst_13 = arith.constant 9.99999997E-7 : f32
    %17 = vector.broadcast %cst_13 : f32 to vector<8x4xf32>
    %18 = arith.addf %16, %17 : vector<8x4xf32>
    %19 = tpu.reciprocal %18 : vector<8x4xf32> -> vector<8x4xf32>
    %cst_14 = arith.constant dense<0.000000e+00> : vector<8x128xf32>
    %20 = tpu.matmul %9, %4, %cst_14 {dimension_numbers = #tpu.dot_dimension_numbers<[1], [0], [0], [1], [0, 0, 1, 1], [], []>, precision = #tpu.contract_precision<fp32>} : vector<8x4xf32>, vector<4x128xf32>, vector<8x128xf32> -> vector<8x128xf32>
    %cst_15 = arith.constant dense<0.000000e+00> : vector<8x128xf32>
    %21 = tpu.matmul %19, %4, %cst_15 {dimension_numbers = #tpu.dot_dimension_numbers<[1], [0], [0], [1], [0, 0, 1, 1], [], []>, precision = #tpu.contract_precision<fp32>} : vector<8x4xf32>, vector<4x128xf32>, vector<8x128xf32> -> vector<8x128xf32>
    %22 = arith.subf %0, %20 : vector<8x128xf32>
    %23 = arith.mulf %22, %21 : vector<8x128xf32>
    %24 = vector.broadcast %1 : vector<1x128xf32> to vector<8x128xf32>
    %25 = arith.mulf %23, %24 : vector<8x128xf32>
    %26 = vector.broadcast %2 : vector<1x128xf32> to vector<8x128xf32>
    %27 = arith.addf %25, %26 : vector<8x128xf32>
    %c0_16 = arith.constant 0 : index
    %c0_17 = arith.constant 0 : index
    %28 = vector.load %arg6[%c0_16, %c0_17] : memref<8x128xf32, #tpu.memory_space<vmem>>, vector<8x128xf32>
    tpu.vector_store %arg6[%c0_16, %c0_17], %27 {strides = array<i32>} : memref<8x128xf32, #tpu.memory_space<vmem>>, vector<8x128xf32>,
    return
  }
  func.func @transform_0(%arg0: i32) -> (i32, i32) {
    %c0_i32 = arith.constant 0 : i32
    %c0_i32_0 = arith.constant 0 : i32
    return %arg0, %c0_i32 : i32, i32
  }
  func.func @transform_1(%arg0: i32) -> (i32, i32) {
    %c0_i32 = arith.constant 0 : i32
    %c0_i32_0 = arith.constant 0 : i32
    %c0_i32_1 = arith.constant 0 : i32
    return %c0_i32, %c0_i32_0 : i32, i32
  }
  func.func @transform_2(%arg0: i32) -> (i32, i32) {
    %c0_i32 = arith.constant 0 : i32
    %c0_i32_0 = arith.constant 0 : i32
    %c0_i32_1 = arith.constant 0 : i32
    return %c0_i32, %c0_i32_0 : i32, i32
  }
  func.func @transform_3(%arg0: i32) -> (i32, i32) {
    %c0_i32 = arith.constant 0 : i32
    %c0_i32_0 = arith.constant 0 : i32
    %c0_i32_1 = arith.constant 0 : i32
    return %c0_i32, %c0_i32_0 : i32, i32
  }
  func.func @transform_4(%arg0: i32) -> (i32, i32) {
    %c0_i32 = arith.constant 0 : i32
    %c0_i32_0 = arith.constant 0 : i32
    %c0_i32_1 = arith.constant 0 : i32
    return %c0_i32, %c0_i32_0 : i32, i32
  }
  func.func @transform_5(%arg0: i32) -> (i32, i32) {
    %c0_i32 = arith.constant 0 : i32
    %c0_i32_0 = arith.constant 0 : i32
    return %arg0, %c0_i32 : i32, i32
  }
}

module attributes {stable_mosaic.version = 11 : i64} {
  func.func @_norm_kernel(%arg0: i32, %arg1: memref<32x32xf32, #tpu.memory_space<vmem>>, %arg2: memref<1x32xf32, #tpu.memory_space<vmem>>, %arg3: memref<1x32xf32, #tpu.memory_space<vmem>>, %arg4: memref<32x32xf32, #tpu.memory_space<vmem>>) attributes {dimension_semantics = [#tpu.dimension_semantics<parallel>], iteration_bounds = array<i64: 1>, scalar_prefetch = 0 : i64, scratch_operands = 0 : i64, tpu.core_type = #tpu.core_type<tc>, window_params = [{transform_indices = @transform_0, window_bounds = array<i64: 32, 32>}, {pipeline_mode = #tpu.pipeline_mode<synchronous>, transform_indices = @transform_1, window_bounds = array<i64: 1, 32>}, {pipeline_mode = #tpu.pipeline_mode<synchronous>, transform_indices = @transform_2, window_bounds = array<i64: 1, 32>}, {transform_indices = @transform_3, window_bounds = array<i64: 32, 32>}]} {
    %c0 = arith.constant 0 : index
    %c0_0 = arith.constant 0 : index
    %0 = vector.load %arg1[%c0, %c0_0] : memref<32x32xf32, #tpu.memory_space<vmem>>, vector<32x32xf32>
    %c0_1 = arith.constant 0 : index
    %c0_2 = arith.constant 0 : index
    %1 = vector.load %arg2[%c0_1, %c0_2] : memref<1x32xf32, #tpu.memory_space<vmem>>, vector<1x32xf32>
    %c0_3 = arith.constant 0 : index
    %c0_4 = arith.constant 0 : index
    %2 = vector.load %arg3[%c0_3, %c0_4] : memref<1x32xf32, #tpu.memory_space<vmem>>, vector<1x32xf32>
    %cst = arith.constant dense<0.000000e+00> : vector<32xf32>
    %3 = vector.multi_reduction <add>, %0, %cst [1] : vector<32x32xf32> to vector<32xf32>
    %4 = vector.shape_cast %3 : vector<32xf32> to vector<32x1xf32>
    %5 = arith.mulf %0, %0 : vector<32x32xf32>
    %cst_5 = arith.constant dense<0.000000e+00> : vector<32xf32>
    %6 = vector.multi_reduction <add>, %5, %cst_5 [1] : vector<32x32xf32> to vector<32xf32>
    %7 = vector.shape_cast %6 : vector<32xf32> to vector<32x1xf32>
    %cst_6 = arith.constant 3.125000e-02 : f32
    %8 = vector.broadcast %cst_6 : f32 to vector<32x1xf32>
    %9 = arith.mulf %4, %8 : vector<32x1xf32>
    %10 = arith.mulf %4, %9 : vector<32x1xf32>
    %11 = arith.subf %7, %10 : vector<32x1xf32>
    %cst_7 = arith.constant 0.000000e+00 : f32
    %12 = vector.broadcast %cst_7 : f32 to vector<32x1xf32>
    %13 = arith.maximumf %11, %12 : vector<32x1xf32>
    %cst_8 = arith.constant 0.0322580636 : f32
    %14 = vector.broadcast %cst_8 : f32 to vector<32x1xf32>
    %15 = arith.mulf %13, %14 : vector<32x1xf32>
    %16 = math.sqrt %15 : vector<32x1xf32>
    %cst_9 = arith.constant 9.99999997E-7 : f32
    %17 = vector.broadcast %cst_9 : f32 to vector<32x1xf32>
    %18 = arith.addf %16, %17 : vector<32x1xf32>
    %19 = tpu.reciprocal %18 : vector<32x1xf32> -> vector<32x1xf32>
    %20 = vector.broadcast %9 : vector<32x1xf32> to vector<32x32xf32>
    %21 = arith.subf %0, %20 : vector<32x32xf32>
    %22 = vector.broadcast %19 : vector<32x1xf32> to vector<32x32xf32>
    %23 = arith.mulf %21, %22 : vector<32x32xf32>
    %24 = vector.broadcast %1 : vector<1x32xf32> to vector<32x32xf32>
    %25 = arith.mulf %23, %24 : vector<32x32xf32>
    %26 = vector.broadcast %2 : vector<1x32xf32> to vector<32x32xf32>
    %27 = arith.addf %25, %26 : vector<32x32xf32>
    %c0_10 = arith.constant 0 : index
    %c0_11 = arith.constant 0 : index
    %28 = vector.load %arg4[%c0_10, %c0_11] : memref<32x32xf32, #tpu.memory_space<vmem>>, vector<32x32xf32>
    tpu.vector_store %arg4[%c0_10, %c0_11], %27 {strides = array<i32>} : memref<32x32xf32, #tpu.memory_space<vmem>>, vector<32x32xf32>,
    return
  }
  func.func @transform_0(%arg0: i32) -> (i32, i32) {
    %c0_i32 = arith.constant 0 : i32
    %c0_i32_0 = arith.constant 0 : i32
    return %arg0, %c0_i32 : i32, i32
  }
  func.func @transform_1(%arg0: i32) -> (i32, i32) {
    %c0_i32 = arith.constant 0 : i32
    %c0_i32_0 = arith.constant 0 : i32
    %c0_i32_1 = arith.constant 0 : i32
    return %c0_i32, %c0_i32_0 : i32, i32
  }
  func.func @transform_2(%arg0: i32) -> (i32, i32) {
    %c0_i32 = arith.constant 0 : i32
    %c0_i32_0 = arith.constant 0 : i32
    %c0_i32_1 = arith.constant 0 : i32
    return %c0_i32, %c0_i32_0 : i32, i32
  }
  func.func @transform_3(%arg0: i32) -> (i32, i32) {
    %c0_i32 = arith.constant 0 : i32
    %c0_i32_0 = arith.constant 0 : i32
    return %arg0, %c0_i32 : i32, i32
  }
}

</mosaic_0001>

<bundles_post_ra>
// kernel: tpu_custom_call.1
= control target key start
LH: loop header
LB: loop body
LE: loop exit
PB: predicated region body
PF: predicated region fallthrough
CT: control target
= control target key end

     0   :  { %v3342_v3 = vmov 0.0|0.0   ;;  %vm3343_vm0 = vmmov 0   ;;  %v3344_v11 = vmov 0.0   ;;  %s3863_s0 = inlined_call_operand.vmem [shape: f32[8,128], index: 0, kind: input, shape index: {}]   ;;  %s3864_s1 = inlined_call_operand.vmem [shape: f32[1,128], index: 1, kind: input, shape index: {}]   ;;  %s3865_s2 = inlined_call_operand.vmem [shape: f32[1,128], index: 2, kind: input, shape index: {}]   ;;  %s3866_s3 = inlined_call_operand.vmem [shape: f32[128,4], index: 3, kind: input, shape index: {}]   ;;  %s3867_s4 = inlined_call_operand.vmem [shape: f32[4,128], index: 4, kind: input, shape index: {}]   ;;  %s3868_s5 = inlined_call_operand.hbm [shape: f32[8,128], index: 5, kind: output, shape index: {}]  }
   0x1   :  { %v24_v0 = vld [vmem:[%s3866_s3] sm:$0xff]  ;;  %v25_v1 = vld [vmem:[%s3866_s3 + $0x8] sm:$0xff]  ;;  %v26_v2 = vld [vmem:[%s3866_s3 + $0x10] sm:$0xff]  ;;  %2982 = vmatprep.subr.bf16.mxu0 %v3342_v3  ;;  %3126 = vmatprep.subr.bf16.mxu1 %v3342_v3 }
   0x2   :  { %v42_v4 = vand.u32 4294901760, %v24_v0  ;;  %v45_v5 = vand.u32 4294901760, %v25_v1  ;;  %v3390_v6 = vld [vmem:[%s3866_s3 + $0x18] sm:$0xff]  ;;  %v48_v7 = vand.u32 4294901760, %v26_v2  ;;  %v3396_v9 = vld [vmem:[%s3866_s3 + $0x20] sm:$0xff]  ;;  %v3401_v10 = vld [vmem:[%s3866_s3 + $0x28] sm:$0xff]  ;;  %2534 = vmatprep.mubr.msk.f32.mxu0 %vm3343_vm0, %v3344_v11  ;;  %2744 = vmatprep.mubr.msk.f32.mxu1 %vm3343_vm0, %v3344_v11 }
   0x3   :  { %v51_v8 = vand.u32 4294901760, %v3390_v6  ;;  %v54_v14 = vand.u32 4294901760, %v3396_v9  ;;  %v57_v15 = vand.u32 4294901760, %v3401_v10  ;;  %v3422_v16 = vld [vmem:[%s3866_s3 + $0x30] sm:$0xff]  ;;  %v3427_v17 = vld [vmem:[%s3866_s3 + $0x38] sm:$0xff] }
   0x4   :  { %v3407_v12 = vpack.c.bf16 %v45_v5, %v42_v4 }
   0x5   :  { %v3413_v13 = vpack.c.bf16 %v51_v8, %v48_v7 }
   0x6   :  { %2984 = vmatpush3.bf16.msra.mxu0 %v3407_v12  ;;  %3128 = vmatpush3.bf16.msra.mxu1 %v3407_v12 }
   0x7   :  { %2985 = vmatprep.subr.bf16.mxu0 %v3342_v3  ;;  %3129 = vmatprep.subr.bf16.mxu1 %v3342_v3 }
   0x8   :  { %10 = vsyncpa [#allocation3], 0  ;;  %v3432_v18 = vld [vmem:[%s3863_s0] sm:$0xff]  ;;  %v3436_v19 = vpack.c.bf16 %v57_v15, %v54_v14  ;;  %v60_v20 = vand.u32 4294901760, %v3422_v16  ;;  %v63_v21 = vand.u32 4294901760, %v3427_v17  ;;  %v33_v23 = vld [vmem:[%s3866_s3 + $0x48] sm:$0xff]  ;;  %v3475_v35 = vsub.f32 %v24_v0, %v42_v4 }
   0x9   :  { %v32_v22 = vld [vmem:[%s3866_s3 + $0x40] sm:$0xff]  ;;  %v3449_v24 = vand.u32 4294901760, %v3432_v18  ;;  %v682_v25 = vmul.f32 %v3432_v18, %v3432_v18  ;;  %v34_v26 = vld [vmem:[%s3866_s3 + $0x50] sm:$0xff]  ;;  %v35_v27 = vld [vmem:[%s3866_s3 + $0x58] sm:$0xff]  ;;  %v69_v31 = vand.u32 4294901760, %v33_v23  ;;  %v3483_v37 = vsub.f32 %v25_v1, %v45_v5  ;;  %s3345_s30 = smov [#allocation2]  }
   0xa   :  { %2987 = vmatpush3.bf16.msra.mxu0 %v3413_v13  ;;  %3131 = vmatpush3.bf16.msra.mxu1 %v3413_v13  ;;  %v36_v28 = vld [vmem:[%s3866_s3 + $0x60] sm:$0xff]  ;;  %v3464_v29 = vpack.c.bf16 %v63_v21, %v60_v20  ;;  %v66_v30 = vand.u32 4294901760, %v32_v22  ;;  %v37_v32 = vld [vmem:[%s3866_s3 + $0x68] sm:$0xff]  ;;  %v38_v33 = vld [vmem:[%s3866_s3 + $0x70] sm:$0xff]  ;;  %v3485_v38 = vsub.f32 %v26_v2, %v48_v7  ;;  %v72_v39 = vand.u32 4294901760, %v34_v26  ;;  %s2264_s6 = sshll.u32 %s3345_s30, 4  ;;  %s2265_s6 = int_to_ptr.vmem [resolvable:$true] %s2264_s6 }
   0xb   :  { %2988 = vmatprep.subr.bf16.mxu0 %v3342_v3  ;;  %3132 = vmatprep.subr.bf16.mxu1 %v3342_v3  ;;  %v39_v34 = vld [vmem:[%s3866_s3 + $0x78] sm:$0xff]  ;;  %v3481_v36 = vsub.f32 %v3432_v18, %v3449_v24  ;;  %v75_v40 = vand.u32 4294901760, %v35_v27  ;;  %v3487_v41 = vand.u32 4294901760, %v682_v25  ;;  %v78_v42 = vand.u32 4294901760, %v36_v28  ;;  %s3318_s7 = scalar_lea.vmem %s2265_s6, 128  ;;  %p3323_p1 = scmp.lt.s32.totalorder %s2265_s6, %s2265_s6 }
   0xc   :  { %v81_v43 = vand.u32 4294901760, %v37_v32  ;;  %v84_v44 = vand.u32 4294901760, %v38_v33  ;;  %v87_v45 = vand.u32 4294901760, %v39_v34  ;;  %v3491_v46 = vpack.c.bf16 %v69_v31, %v66_v30  ;;  %p3319_p0 = scmp.ne.s32.totalorder %s2265_s6, %s3318_s7  ;;  %p3324_p2 = scmp.lt.s32.totalorder %s3318_s7, %s3318_s7 }
   0xd   :  { %v135_v47 = vand.u32 4294901760, %v3475_v35  ;;  %v3870_v48 = vand.u32 4294901760, %v3481_v36  ;;  %v142_v49 = vand.u32 4294901760, %v3483_v37  ;;  %v149_v50 = vand.u32 4294901760, %v3485_v38 }
   0xe   :  { %2990 = vmatpush3.bf16.msra.mxu0 %v3436_v19  ;;  %3134 = vmatpush3.bf16.msra.mxu1 %v3436_v19  ;;  %v3502_v51 = vsub.f32 %v3390_v6, %v51_v8  ;;  %v3505_v52 = vsub.f32 %v682_v25, %v3487_v41  ;;  %v3507_v53 = vpack.c.bf16 %v75_v40, %v72_v39  ;;  %vm1342_vm1 = vcmask 1043456   ;;  %p3325_p3 = por %p3324_p2, %p3323_p1 }
   0xf   :  { %2991 = vmatprep.subr.bf16.mxu0 %v3342_v3  ;;  %3135 = vmatprep.subr.bf16.mxu1 %v3342_v3  ;;  %v3509_v54 = vpack.c.bf16 %v81_v43, %v78_v42  ;;  %v3511_v55 = vpack.c.bf16 %v87_v45, %v84_v44  ;;  %v136_v56 = vsub.f32 %v3475_v35, %v135_v47  ;;  %vm1338_vm2 = vcmask 31744  }
  0x10   :  { %v3517_v57 = vsub.f32 %v3396_v9, %v54_v14  ;;  %v3520_v58 = vsub.f32 %v3401_v10, %v57_v15  ;;  %v125_v59 = vsub.f32 %v3481_v36, %v3870_v48  ;;  %v143_v60 = vsub.f32 %v3483_v37, %v142_v49  ;;  %p3326_p4 = pnand %p3325_p3, %p3319_p0 }
  0x11   :  { %v3529_v61 = vsub.f32 %v3485_v38, %v149_v50  ;;  %v156_v62 = vand.u32 4294901760, %v3502_v51  ;;  %v3869_v63 = vand.u32 4294901760, %v3505_v52  ;;  %v3534_v0 = vsub.f32 %v3422_v16, %v60_v20 }
  0x12   :  { %2993 = vmatpush3.bf16.msra.mxu0 %v3464_v29  ;;  %3137 = vmatpush3.bf16.msra.mxu1 %v3464_v29  ;;  %v3537_v1 = vsub.f32 %v3427_v17, %v63_v21  ;;  %v3539_v2 = vsub.f32 %v32_v22, %v66_v30  ;;  %v3541_v4 = vsub.f32 %v33_v23, %v69_v31  ;;  %v163_v8 = vand.u32 4294901760, %v3517_v57 }
  0x13   :  { %2994 = vmatprep.subr.bf16.mxu0 %v3342_v3  ;;  %3138 = vmatprep.subr.bf16.mxu1 %v3342_v3  ;;  %v3543_v5 = vsub.f32 %v34_v26, %v72_v39  ;;  %v3545_v6 = vsub.f32 %v35_v27, %v75_v40  ;;  %v3547_v7 = vsub.f32 %v36_v28, %v78_v42  ;;  %v137_v15 = vand.u32 4294901760, %v136_v56 }
  0x14   :  { %v3552_v9 = vsub.f32 %v37_v32, %v81_v43  ;;  %v3554_v10 = vsub.f32 %v38_v33, %v84_v44  ;;  %v3556_v14 = vsub.f32 %v39_v34, %v87_v45  ;;  %v144_v16 = vand.u32 4294901760, %v143_v60 }
  0x15   :  { %v157_v17 = vsub.f32 %v3502_v51, %v156_v62  ;;  %v170_v20 = vand.u32 4294901760, %v3520_v58  ;;  %v767_v21 = vsub.f32 %v3505_v52, %v3869_v63  ;;  %v177_v22 = vand.u32 4294901760, %v3534_v0 }
  0x16   :  { %2996 = vmatpush3.bf16.msra.mxu0 %v3491_v46  ;;  %3140 = vmatpush3.bf16.msra.mxu1 %v3491_v46  ;;  %v184_v23 = vand.u32 4294901760, %v3537_v1  ;;  %v191_v25 = vand.u32 4294901760, %v3539_v2  ;;  %v198_v26 = vand.u32 4294901760, %v3541_v4  ;;  %v205_v27 = vand.u32 4294901760, %v3543_v5 }
  0x17   :  { %2997 = vmatprep.subr.bf16.mxu0 %v3342_v3  ;;  %3141 = vmatprep.subr.bf16.mxu1 %v3342_v3  ;;  %v212_v28 = vand.u32 4294901760, %v3545_v6  ;;  %v219_v30 = vand.u32 4294901760, %v3547_v7  ;;  %v226_v31 = vand.u32 4294901760, %v3552_v9  ;;  %v233_v32 = vand.u32 4294901760, %v3554_v10 }
  0x18   :  { %v3871_v33 = vand.u32 4294901760, %v3556_v14  ;;  %v3577_v34 = vpack.c.bf16 %v142_v49, %v135_v47  ;;  %v3581_v39 = vpack.c.bf16 %v156_v62, %v149_v50  ;;  %v3583_v40 = vpack.c.bf16 %v170_v20, %v163_v8 }
  0x19   :  { %v3585_v42 = vpack.c.bf16 %v184_v23, %v177_v22  ;;  %v3587_v43 = vpack.c.bf16 %v198_v26, %v191_v25  ;;  %v3589_v44 = vpack.c.bf16 %v212_v28, %v205_v27  ;;  %v3591_v45 = vpack.c.bf16 %v226_v31, %v219_v30 }
  0x1a   :  { %2999 = vmatpush3.bf16.msra.mxu0 %v3507_v53  ;;  %3143 = vmatpush3.bf16.msra.mxu1 %v3507_v53  ;;  %v3597_v47 = vpack.c.bf16 %v3871_v33, %v233_v32  ;;  %v126_v49 = vand.u32 4294901760, %v125_v59  ;;  %v768_v56 = vand.u32 4294901760, %v767_v21  ;;  %v164_v50 = vsub.f32 %v3517_v57, %v163_v8 }
  0x1b   :  { %3000 = vmatprep.subr.bf16.mxu0 %v3342_v3  ;;  %3144 = vmatprep.subr.bf16.mxu1 %v3342_v3  ;;  %v171_v60 = vsub.f32 %v3520_v58, %v170_v20  ;;  %v3007_v62 = vpack.c.bf16 %v144_v16, %v137_v15  ;;  %v151_v63 = vand.u32 4294901760, %v3529_v61  ;;  %v158_v48 = vand.u32 4294901760, %v157_v17 }
  0x1c   :  { %v165_v59 = vand.u32 4294901760, %v164_v50  ;;  %v178_v20 = vsub.f32 %v3534_v0, %v177_v22  ;;  %v185_v33 = vsub.f32 %v3537_v1, %v184_v23  ;;  %v206_v17 = vsub.f32 %v3543_v5, %v205_v27 }
  0x1d   :  { %v172_v21 = vand.u32 4294901760, %v171_v60  ;;  %v3010_v8 = vpack.c.bf16 %v158_v48, %v151_v63  ;;  %v192_v48 = vsub.f32 %v3539_v2, %v191_v25  ;;  %v199_v63 = vsub.f32 %v3541_v4, %v198_v26 }
  0x1e   :  { %3002 = vmatpush3.bf16.msra.mxu0 %v3509_v54  ;;  %3146 = vmatpush3.bf16.msra.mxu1 %v3509_v54  ;;  %v179_v15 = vand.u32 4294901760, %v178_v20  ;;  %v186_v16 = vand.u32 4294901760, %v185_v33  ;;  %v220_v25 = vsub.f32 %v3547_v7, %v219_v30  ;;  %v207_v33 = vand.u32 4294901760, %v206_v17 }
  0x1f   :  { %3003 = vmatprep.subr.bf16.mxu0 %v3342_v3  ;;  %3147 = vmatprep.subr.bf16.mxu1 %v3342_v3  ;;  %v3013_v61 = vpack.c.bf16 %v172_v21, %v165_v59  ;;  %v193_v23 = vand.u32 4294901760, %v192_v48  ;;  %v227_v27 = vsub.f32 %v3552_v9, %v226_v31  ;;  %v234_v30 = vsub.f32 %v3554_v10, %v233_v32 }
  0x20   :  { %v3016_v22 = vpack.c.bf16 %v186_v16, %v179_v15  ;;  %v221_v60 = vand.u32 4294901760, %v220_v25  ;;  %v3872_v59 = vand.u32 4294901760, %v3556_v14  ;;  %v3034_v15 = vpack.c.bf16 %v3502_v51, %v3485_v38 }
  0x21   :  { %v3043_v38 = vpack.c.bf16 %v3541_v4, %v3539_v2  ;;  %v3046_v51 = vpack.c.bf16 %v3545_v6, %v3543_v5 }
  0x22   :  { %3005 = vmatpush3.bf16.msra.mxu0 %v3511_v55  ;;  %3149 = vmatpush3.bf16.msra.mxu1 %v3511_v55  ;;  %v241_v21 = vsub.f32 %v3556_v14, %v3872_v59 }
  0x23   :  { %3006 = vmatprep.subr.bf16.mxu0 %v3342_v3  ;;  %3150 = vmatprep.subr.bf16.mxu1 %v3342_v3 }
  0x24   :  { %v242_v20 = vand.u32 4294901760, %v241_v21 }
  0x25   :  { %2535 = vmatmul.mubr.f32.vlgmr.msra.gmra.mrb[0].mxu0 %v126_v49  ;;  %2745 = vmatmul.mubr.f32.vlgmr.msra.gmra.mrb[0].mxu1 %v768_v56  ;;  %v200_v49 = vand.u32 4294901760, %v199_v63  ;;  %v213_v56 = vsub.f32 %v3545_v6, %v212_v28 }
  0x26   :  { %3008 = vmatpush3.bf16.msra.mxu0 %v3007_v62  ;;  %3152 = vmatpush3.bf16.msra.mxu1 %v3007_v62  ;;  %v228_v62 = vand.u32 4294901760, %v227_v27 }
  0x27   :  { %3009 = vmatprep.subr.bf16.mxu0 %v3342_v3  ;;  %3153 = vmatprep.subr.bf16.mxu1 %v3342_v3  ;;  %v3019_v26 = vpack.c.bf16 %v200_v49, %v193_v23  ;;  %v214_v50 = vand.u32 4294901760, %v213_v56 }
  0x28   :  { %2569 = vmatprep.mubr.msk.f32.mxu0 %vm3343_vm0, %v3344_v11  ;;  %2779 = vmatprep.mubr.msk.f32.mxu1 %vm3343_vm0, %v3344_v11  ;;  %v3025_v31 = vpack.c.bf16 %v228_v62, %v221_v60  ;;  %v2273_v60 = vld [vmem:[%s3865_s2] ss:$0 sm:$0xff] }
  0x29   :  { %v3022_v28 = vpack.c.bf16 %v214_v50, %v207_v33 }
  0x2a   :  { %3011 = vmatpush3.bf16.msra.mxu0 %v3010_v8  ;;  %3155 = vmatpush3.bf16.msra.mxu1 %v3010_v8  ;;  %v235_v8 = vand.u32 4294901760, %v234_v30 }
  0x2b   :  { %3012 = vmatprep.subr.bf16.mxu0 %v3342_v3  ;;  %3156 = vmatprep.subr.bf16.mxu1 %v3342_v3 }
  0x2c   :  { %v3028_v32 = vpack.c.bf16 %v242_v20, %v235_v8 }
  0x2e   :  { %3014 = vmatpush3.bf16.msra.mxu0 %v3013_v61  ;;  %3158 = vmatpush3.bf16.msra.mxu1 %v3013_v61  ;;  %v3031_v61 = vpack.c.bf16 %v3483_v37, %v3475_v35  ;;  %v3037_v35 = vpack.c.bf16 %v3520_v58, %v3517_v57  ;;  %v3040_v37 = vpack.c.bf16 %v3537_v1, %v3534_v0  ;;  %v3873_v0 = vand.u32 4294901760, %v3481_v36 }
  0x2f   :  { %3015 = vmatprep.subr.bf16.mxu0 %v3342_v3  ;;  %3159 = vmatprep.subr.bf16.mxu1 %v3342_v3  ;;  %v3049_v57 = vpack.c.bf16 %v3552_v9, %v3547_v7  ;;  %v3052_v58 = vpack.c.bf16 %v3556_v14, %v3554_v10  ;;  %v3874_v1 = vand.u32 4294901760, %v3505_v52 }
  0x32   :  { %3017 = vmatpush3.bf16.msra.mxu0 %v3016_v22  ;;  %3161 = vmatpush3.bf16.msra.mxu1 %v3016_v22 }
  0x33   :  { %3018 = vmatprep.subr.bf16.mxu0 %v3342_v3  ;;  %3162 = vmatprep.subr.bf16.mxu1 %v3342_v3 }
  0x36   :  { %3020 = vmatpush3.bf16.msra.mxu0 %v3019_v26  ;;  %3164 = vmatpush3.bf16.msra.mxu1 %v3019_v26  ;;  %v2272_v26 = vld [vmem:[%s3864_s1] ss:$0 sm:$0xff] }
  0x37   :  { %3021 = vmatprep.subr.bf16.mxu0 %v3342_v3  ;;  %3165 = vmatprep.subr.bf16.mxu1 %v3342_v3 }
  0x3a   :  { %3023 = vmatpush3.bf16.msra.mxu0 %v3022_v28  ;;  %3167 = vmatpush3.bf16.msra.mxu1 %v3022_v28 }
  0x3b   :  { %3024 = vmatprep.subr.bf16.mxu0 %v3342_v3  ;;  %3168 = vmatprep.subr.bf16.mxu1 %v3342_v3 }
  0x3e   :  { %3026 = vmatpush3.bf16.msra.mxu0 %v3025_v31  ;;  %3170 = vmatpush3.bf16.msra.mxu1 %v3025_v31 }
  0x3f   :  { %3027 = vmatprep.subr.bf16.mxu0 %v3342_v3  ;;  %3171 = vmatprep.subr.bf16.mxu1 %v3342_v3 }
  0x42   :  { %3029 = vmatpush3.bf16.msra.mxu0 %v3028_v32  ;;  %3173 = vmatpush3.bf16.msra.mxu1 %v3028_v32 }
  0x43   :  { %3030 = vmatprep.subr.bf16.mxu0 %v3342_v3  ;;  %3174 = vmatprep.subr.bf16.mxu1 %v3342_v3 }
  0x45   :  { %2570 = vmatmul.mubr.f32.vlgmr.msra.gmra.mrb[0].mxu0 %v3449_v24  ;;  %2780 = vmatmul.mubr.f32.vlgmr.msra.gmra.mrb[0].mxu1 %v3487_v41 }
  0x46   :  { %3032 = vmatpush3.bf16.msra.mxu0 %v3031_v61  ;;  %3176 = vmatpush3.bf16.msra.mxu1 %v3031_v61 }
  0x47   :  { %3033 = vmatprep.subr.bf16.mxu0 %v3342_v3  ;;  %3177 = vmatprep.subr.bf16.mxu1 %v3342_v3 }
  0x48   :  { %2604 = vmatprep.mubr.msk.f32.mxu0 %vm3343_vm0, %v3344_v11  ;;  %2814 = vmatprep.mubr.msk.f32.mxu1 %vm3343_vm0, %v3344_v11 }
  0x4a   :  { %3035 = vmatpush3.bf16.msra.mxu0 %v3034_v15  ;;  %3179 = vmatpush3.bf16.msra.mxu1 %v3034_v15 }
  0x4b   :  { %3036 = vmatprep.subr.bf16.mxu0 %v3342_v3  ;;  %3180 = vmatprep.subr.bf16.mxu1 %v3342_v3 }
  0x4e   :  { %3038 = vmatpush3.bf16.msra.mxu0 %v3037_v35  ;;  %3182 = vmatpush3.bf16.msra.mxu1 %v3037_v35 }
  0x4f   :  { %3039 = vmatprep.subr.bf16.mxu0 %v3342_v3  ;;  %3183 = vmatprep.subr.bf16.mxu1 %v3342_v3 }
  0x52   :  { %3041 = vmatpush3.bf16.msra.mxu0 %v3040_v37  ;;  %3185 = vmatpush3.bf16.msra.mxu1 %v3040_v37 }
  0x53   :  { %3042 = vmatprep.subr.bf16.mxu0 %v3342_v3  ;;  %3186 = vmatprep.subr.bf16.mxu1 %v3342_v3 }
  0x56   :  { %3044 = vmatpush3.bf16.msra.mxu0 %v3043_v38  ;;  %3188 = vmatpush3.bf16.msra.mxu1 %v3043_v38 }
  0x57   :  { %3045 = vmatprep.subr.bf16.mxu0 %v3342_v3  ;;  %3189 = vmatprep.subr.bf16.mxu1 %v3342_v3 }
  0x5a   :  { %3047 = vmatpush3.bf16.msra.mxu0 %v3046_v51  ;;  %3191 = vmatpush3.bf16.msra.mxu1 %v3046_v51 }
  0x5b   :  { %3048 = vmatprep.subr.bf16.mxu0 %v3342_v3  ;;  %3192 = vmatprep.subr.bf16.mxu1 %v3342_v3 }
  0x5e   :  { %3050 = vmatpush3.bf16.msra.mxu0 %v3049_v57  ;;  %3194 = vmatpush3.bf16.msra.mxu1 %v3049_v57 }
  0x5f   :  { %3051 = vmatprep.subr.bf16.mxu0 %v3342_v3  ;;  %3195 = vmatprep.subr.bf16.mxu1 %v3342_v3 }
  0x62   :  { %3053 = vmatpush3.bf16.msra.mxu0 %v3052_v58  ;;  %3197 = vmatpush3.bf16.msra.mxu1 %v3052_v58 }
  0x63   :  { %3054 = vmatprep.subr.bf16.mxu0 %v3342_v3  ;;  %3198 = vmatprep.subr.bf16.mxu1 %v3342_v3 }
  0x65   :  { %2605 = vmatmul.mubr.f32.vlgmr.msra.gmra.mrb[0].mxu0 %v3481_v36  ;;  %2815 = vmatmul.mubr.f32.vlgmr.msra.gmra.mrb[0].mxu1 %v3505_v52 }
  0x66   :  { %3056 = vmatpush3.bf16.msra.mxu0 %v3407_v12  ;;  %3200 = vmatpush3.bf16.msra.mxu1 %v3407_v12 }
  0x67   :  { %3057 = vmatprep.subr.bf16.mxu0 %v3342_v3  ;;  %3201 = vmatprep.subr.bf16.mxu1 %v3342_v3 }
  0x68   :  { %2639 = vmatprep.mubr.msk.f32.mxu0 %vm3343_vm0, %v3344_v11  ;;  %2849 = vmatprep.mubr.msk.f32.mxu1 %vm3343_vm0, %v3344_v11 }
  0x6a   :  { %3059 = vmatpush3.bf16.msra.mxu0 %v3413_v13  ;;  %3203 = vmatpush3.bf16.msra.mxu1 %v3413_v13 }
  0x6b   :  { %3060 = vmatprep.subr.bf16.mxu0 %v3342_v3  ;;  %3204 = vmatprep.subr.bf16.mxu1 %v3342_v3 }
  0x6e   :  { %3062 = vmatpush3.bf16.msra.mxu0 %v3436_v19  ;;  %3206 = vmatpush3.bf16.msra.mxu1 %v3436_v19 }
  0x6f   :  { %3063 = vmatprep.subr.bf16.mxu0 %v3342_v3  ;;  %3207 = vmatprep.subr.bf16.mxu1 %v3342_v3 }
  0x72   :  { %3065 = vmatpush3.bf16.msra.mxu0 %v3464_v29  ;;  %3209 = vmatpush3.bf16.msra.mxu1 %v3464_v29 }
  0x73   :  { %3066 = vmatprep.subr.bf16.mxu0 %v3342_v3  ;;  %3210 = vmatprep.subr.bf16.mxu1 %v3342_v3 }
  0x76   :  { %3068 = vmatpush3.bf16.msra.mxu0 %v3491_v46  ;;  %3212 = vmatpush3.bf16.msra.mxu1 %v3491_v46 }
  0x77   :  { %3069 = vmatprep.subr.bf16.mxu0 %v3342_v3  ;;  %3213 = vmatprep.subr.bf16.mxu1 %v3342_v3 }
  0x7a   :  { %3071 = vmatpush3.bf16.msra.mxu0 %v3507_v53  ;;  %3215 = vmatpush3.bf16.msra.mxu1 %v3507_v53 }
  0x7b   :  { %3072 = vmatprep.subr.bf16.mxu0 %v3342_v3  ;;  %3216 = vmatprep.subr.bf16.mxu1 %v3342_v3 }
  0x7e   :  { %3074 = vmatpush3.bf16.msra.mxu0 %v3509_v54  ;;  %3218 = vmatpush3.bf16.msra.mxu1 %v3509_v54 }
  0x7f   :  { %3075 = vmatprep.subr.bf16.mxu0 %v3342_v3  ;;  %3219 = vmatprep.subr.bf16.mxu1 %v3342_v3 }
  0x82   :  { %3077 = vmatpush3.bf16.msra.mxu0 %v3511_v55  ;;  %3221 = vmatpush3.bf16.msra.mxu1 %v3511_v55 }
  0x83   :  { %3078 = vmatprep.subr.bf16.mxu0 %v3342_v3  ;;  %3222 = vmatprep.subr.bf16.mxu1 %v3342_v3 }
  0x85   :  { %2640 = vmatmul.mubr.f32.vlgmr.msra.gmra.mrb[0].mxu0 %v3873_v0  ;;  %2850 = vmatmul.mubr.f32.vlgmr.msra.gmra.mrb[0].mxu1 %v3874_v1 }
  0x86   :  { %3080 = vmatpush3.bf16.msra.mxu0 %v3577_v34  ;;  %3224 = vmatpush3.bf16.msra.mxu1 %v3577_v34 }
  0x87   :  { %3081 = vmatprep.subr.bf16.mxu0 %v3342_v3  ;;  %3225 = vmatprep.subr.bf16.mxu1 %v3342_v3 }
  0x88   :  { %2674 = vmatprep.mubr.msk.f32.mxu0 %vm3343_vm0, %v3344_v11  ;;  %2884 = vmatprep.mubr.msk.f32.mxu1 %vm3343_vm0, %v3344_v11 }
  0x8a   :  { %3083 = vmatpush3.bf16.msra.mxu0 %v3581_v39  ;;  %3227 = vmatpush3.bf16.msra.mxu1 %v3581_v39 }
  0x8b   :  { %3084 = vmatprep.subr.bf16.mxu0 %v3342_v3  ;;  %3228 = vmatprep.subr.bf16.mxu1 %v3342_v3 }
  0x8e   :  { %3086 = vmatpush3.bf16.msra.mxu0 %v3583_v40  ;;  %3230 = vmatpush3.bf16.msra.mxu1 %v3583_v40 }
  0x8f   :  { %3087 = vmatprep.subr.bf16.mxu0 %v3342_v3  ;;  %3231 = vmatprep.subr.bf16.mxu1 %v3342_v3 }
  0x92   :  { %3089 = vmatpush3.bf16.msra.mxu0 %v3585_v42  ;;  %3233 = vmatpush3.bf16.msra.mxu1 %v3585_v42 }
  0x93   :  { %3090 = vmatprep.subr.bf16.mxu0 %v3342_v3  ;;  %3234 = vmatprep.subr.bf16.mxu1 %v3342_v3 }
  0x96   :  { %3092 = vmatpush3.bf16.msra.mxu0 %v3587_v43  ;;  %3236 = vmatpush3.bf16.msra.mxu1 %v3587_v43 }
  0x97   :  { %3093 = vmatprep.subr.bf16.mxu0 %v3342_v3  ;;  %3237 = vmatprep.subr.bf16.mxu1 %v3342_v3 }
  0x9a   :  { %3095 = vmatpush3.bf16.msra.mxu0 %v3589_v44  ;;  %3239 = vmatpush3.bf16.msra.mxu1 %v3589_v44 }
  0x9b   :  { %3096 = vmatprep.subr.bf16.mxu0 %v3342_v3  ;;  %3240 = vmatprep.subr.bf16.mxu1 %v3342_v3 }
  0x9e   :  { %3098 = vmatpush3.bf16.msra.mxu0 %v3591_v45  ;;  %3242 = vmatpush3.bf16.msra.mxu1 %v3591_v45 }
  0x9f   :  { %3099 = vmatprep.subr.bf16.mxu0 %v3342_v3  ;;  %3243 = vmatprep.subr.bf16.mxu1 %v3342_v3 }
  0xa2   :  { %3101 = vmatpush3.bf16.msra.mxu0 %v3597_v47  ;;  %3245 = vmatpush3.bf16.msra.mxu1 %v3597_v47 }
  0xa3   :  { %3102 = vmatprep.subr.bf16.mxu0 %v3342_v3  ;;  %3246 = vmatprep.subr.bf16.mxu1 %v3342_v3 }
  0xa5   :  { %2675 = vmatmul.mubr.f32.vlgmr.msra.gmra.mrb[0].mxu0 %v3449_v24  ;;  %2885 = vmatmul.mubr.f32.vlgmr.msra.gmra.mrb[0].mxu1 %v3487_v41 }
  0xa6   :  { %3104 = vmatpush3.bf16.msra.mxu0 %v3407_v12  ;;  %3248 = vmatpush3.bf16.msra.mxu1 %v3407_v12 }
  0xa7   :  { %3105 = vmatprep.subr.bf16.mxu0 %v3342_v3  ;;  %3249 = vmatprep.subr.bf16.mxu1 %v3342_v3 }
  0xa8   :  { %2709 = vmatprep.mubr.msk.f32.mxu0 %vm3343_vm0, %v3344_v11  ;;  %2919 = vmatprep.mubr.msk.f32.mxu1 %vm3343_vm0, %v3344_v11 }
  0xaa   :  { %3107 = vmatpush3.bf16.msra.mxu0 %v3413_v13  ;;  %3251 = vmatpush3.bf16.msra.mxu1 %v3413_v13 }
  0xab   :  { %3108 = vmatprep.subr.bf16.mxu0 %v3342_v3  ;;  %3252 = vmatprep.subr.bf16.mxu1 %v3342_v3 }
  0xae   :  { %3110 = vmatpush3.bf16.msra.mxu0 %v3436_v19  ;;  %3254 = vmatpush3.bf16.msra.mxu1 %v3436_v19 }
  0xaf   :  { %3111 = vmatprep.subr.bf16.mxu0 %v3342_v3  ;;  %3255 = vmatprep.subr.bf16.mxu1 %v3342_v3 }
  0xb2   :  { %3113 = vmatpush3.bf16.msra.mxu0 %v3464_v29  ;;  %3257 = vmatpush3.bf16.msra.mxu1 %v3464_v29 }
  0xb3   :  { %3114 = vmatprep.subr.bf16.mxu0 %v3342_v3  ;;  %3258 = vmatprep.subr.bf16.mxu1 %v3342_v3 }
  0xb6   :  { %3116 = vmatpush3.bf16.msra.mxu0 %v3491_v46  ;;  %3260 = vmatpush3.bf16.msra.mxu1 %v3491_v46 }
  0xb7   :  { %3117 = vmatprep.subr.bf16.mxu0 %v3342_v3  ;;  %3261 = vmatprep.subr.bf16.mxu1 %v3342_v3 }
  0xba   :  { %3119 = vmatpush3.bf16.msra.mxu0 %v3507_v53  ;;  %3263 = vmatpush3.bf16.msra.mxu1 %v3507_v53 }
  0xbb   :  { %3120 = vmatprep.subr.bf16.mxu0 %v3342_v3  ;;  %3264 = vmatprep.subr.bf16.mxu1 %v3342_v3 }
  0xbe   :  { %3122 = vmatpush3.bf16.msra.mxu0 %v3509_v54  ;;  %3266 = vmatpush3.bf16.msra.mxu1 %v3509_v54 }
  0xbf   :  { %3123 = vmatprep.subr.bf16.mxu0 %v3342_v3  ;;  %3267 = vmatprep.subr.bf16.mxu1 %v3342_v3  ;;  %v40_v3 = vld [vmem:[%s3867_s4] sm:$0xf] }
  0xc0   :  { %v1344_v12 = vsel %vm1342_vm1, %v40_v3, 0 }
  0xc1   :  { %v3803_v13 = vand.u32 4294901760, %v1344_v12 }
  0xc2   :  { %3125 = vmatpush3.bf16.msra.mxu0 %v3511_v55  ;;  %3269 = vmatpush3.bf16.msra.mxu1 %v3511_v55 }
  0xc3   :  { %2922 = vmatprep.subr.mxu0 %v3344_v11  ;;  %2952 = vmatprep.subr.mxu1 %v3344_v11  ;;  %v1424_v19 = vsub.f32 %v1344_v12, %v3803_v13 }
  0xc5   :  { %2710 = vmatmul.mubr.f32.vlgmr.msra.gmra.mrb[0].mxu0 %v3449_v24  ;;  %2920 = vmatmul.mubr.f32.vlgmr.msra.gmra.mrb[0].mxu1 %v3487_v41  ;;  %v1425_v54 = vand.u32 4294901760, %v1424_v19 }
  0xc6   :  { %2924 = vmatprep.mubr.msk.f32.mxu0 %vm3343_vm0, %v3344_v11  ;;  %2954 = vmatprep.mubr.msk.f32.mxu1 %vm3343_vm0, %v3344_v11 }
  0xc7   :  { %2923 = vmatpush3.msra.mxu0 %v3803_v13  ;;  %2953 = vmatpush3.msra.mxu1 %v3803_v13  ;;  %v1426_v6 = vsub.f32 %v1424_v19, %v1425_v54 }
  0xc8   :  { %2927 = vmatprep.subr.mxu0 %v3344_v11  ;;  %2957 = vmatprep.subr.mxu1 %v3344_v11 }
  0xc9   :  { %v1427_v14 = vand.u32 4294901760, %v1426_v6 }
 0x198   :  { %v678_v24 = vpop.f32.mrb[0].mxu0  ;;  %v1320_v29 = vpop.f32.mrb[0].mxu1 }
 0x199   :  { %v1324_v36 = vmul.f32 0.03125, %v678_v24  ;;  %v2711_v41 = vpop.f32.mrb[1].mxu0  ;;  %v2921_v46 = vpop.f32.mrb[1].mxu1 }
 0x19b   :  { %v1325_v52 = vmul.f32 %v1324_v36, %v678_v24  ;;  %v1340_v53 = vsel %vm1338_vm2, %v1324_v36, 0 }
 0x19c   :  { %v1412_v55 = vand.u32 4294901760, %v1340_v53 }
 0x19d   :  { %v1326_v2 = vsub.f32 %v1320_v29, %v1325_v52 }
 0x19e   :  { %v1413_v4 = vsub.f32 %v1340_v53, %v1412_v55 }
 0x19f   :  { %v1327_v5 = vmax.f32 %v1326_v2, 0.0 }
 0x1a0   :  { %v1414_v7 = vand.u32 4294901760, %v1413_v4 }
 0x1a1   :  { %v1328_v9 = vmul.f32 0.032258064, %v1327_v5 }
 0x1a2   :  { %v1415_v10 = vsub.f32 %v1413_v4, %v1414_v7 }
 0x1a3   :  { %3314 = vrsqrt.f32 %v1328_v9  ;;  %vm1331_vm3 = vcmp.eq.f32.partialorder %v1328_v9, inf  ;;  %v1334_v42 = vand.u32 2147483648, %v1328_v9  ;;  %vm1333_vm4 = vcmp.eq.f32.partialorder %v1328_v9, 0.0 }
 0x1a4   :  { %v1416_v34 = vand.u32 4294901760, %v1415_v10 }
 0x1a6   :  { %2925 = vmatmul.mubr.f32.vlgmr.msra.gmra.mrb[2].mxu0 %v1416_v34 }
 0x1a7   :  { %2928 = vmatpush3.msra.mxu0 %v1427_v14  ;;  %2929 = vmatprep.mubr.msk.f32.mxu0 %vm3343_vm0, %v3344_v11 }
 0x1a8   :  { %2932 = vmatprep.subr.mxu0 %v3344_v11 }
 0x1ad   :  { %v3315_v39 = vpop.eup %3314 }
 0x1ae   :  { %v1330_v40 = vmul.f32 %v3315_v39, %v1328_v9  ;;  %2930 = vmatmul.mubr.f32.vlgmr.msra.gmra.mrb[2].mxu0 %v1412_v55 }
 0x1af   :  { %2933 = vmatpush3.msra.mxu0 %v1424_v19  ;;  %2934 = vmatprep.mubr.msk.f32.mxu0 %vm3343_vm0, %v3344_v11 }
 0x1b0   :  { %v1332_v43 = vsel %vm1331_vm3, %v1328_v9, %v1330_v40  ;;  %2937 = vmatprep.subr.mxu0 %v3344_v11 }
 0x1b1   :  { %v1335_v44 = vsel %vm1333_vm4, %v1334_v42, %v1332_v43 }
 0x1b2   :  { %v1336_v45 = vadd.f32 1e-06, %v1335_v44 }
 0x1b4   :  { %3316 = vrcp.f32 %v1336_v45 }
 0x1b6   :  { %2935 = vmatmul.mubr.f32.vlgmr.msra.gmra.mrb[2].mxu0 %v1413_v4 }
 0x1b7   :  { %2938 = vmatpush3.msra.mxu0 %v3803_v13  ;;  %2939 = vmatprep.mubr.msk.f32.mxu0 %vm3343_vm0, %v3344_v11 }
 0x1b8   :  { %2942 = vmatprep.subr.mxu0 %v3344_v11 }
 0x1be   :  { %v3317_v47 = vpop.eup %3316  ;;  %2940 = vmatmul.mubr.f32.vlgmr.msra.gmra.mrb[2].mxu0 %v1414_v7 }
 0x1bf   :  { %2943 = vmatpush3.msra.mxu0 %v1425_v54  ;;  %2944 = vmatprep.mubr.msk.f32.mxu0 %vm3343_vm0, %v3344_v11  ;;  %v1793_v16 = vsel %vm1338_vm2, %v3317_v47, 0 }
 0x1c0   :  { %v1861_v48 = vand.u32 4294901760, %v1793_v16  ;;  %2947 = vmatprep.subr.mxu0 %v3344_v11 }
 0x1c2   :  { %v1862_v63 = vsub.f32 %v1793_v16, %v1861_v48 }
 0x1c4   :  { %v1863_v17 = vand.u32 4294901760, %v1862_v63 }
 0x1c6   :  { %2945 = vmatmul.mubr.f32.vlgmr.msra.gmra.mrb[2].mxu0 %v1412_v55  ;;  %v1864_v22 = vsub.f32 %v1862_v63, %v1863_v17 }
 0x1c7   :  { %2948 = vmatpush3.msra.mxu0 %v3803_v13  ;;  %2949 = vmatprep.mubr.msk.f32.mxu0 %vm3343_vm0, %v3344_v11 }
 0x1c8   :  { %v1865_v23 = vand.u32 4294901760, %v1864_v22 }
 0x1ca   :  { %2955 = vmatmul.mubr.f32.vlgmr.msra.gmra.mrb[2].mxu1 %v1865_v23 }
 0x1cb   :  { %2958 = vmatpush3.msra.mxu1 %v1427_v14  ;;  %2959 = vmatprep.mubr.msk.f32.mxu1 %vm3343_vm0, %v3344_v11 }
 0x1cc   :  { %2962 = vmatprep.subr.mxu1 %v3344_v11 }
 0x1ce   :  { %2950 = vmatmul.mubr.f32.vlgmr.msra.gmra.mrb[2].mxu0 %v1412_v55 }
 0x1d2   :  { %2960 = vmatmul.mubr.f32.vlgmr.msra.gmra.mrb[2].mxu1 %v1861_v48 }
 0x1d3   :  { %2963 = vmatpush3.msra.mxu1 %v1424_v19  ;;  %2964 = vmatprep.mubr.msk.f32.mxu1 %vm3343_vm0, %v3344_v11 }
 0x1d4   :  { %2967 = vmatprep.subr.mxu1 %v3344_v11 }
 0x1da   :  { %2965 = vmatmul.mubr.f32.vlgmr.msra.gmra.mrb[2].mxu1 %v1862_v63 }
 0x1db   :  { %2968 = vmatpush3.msra.mxu1 %v3803_v13  ;;  %2969 = vmatprep.mubr.msk.f32.mxu1 %vm3343_vm0, %v3344_v11 }
 0x1dc   :  { %2972 = vmatprep.subr.mxu1 %v3344_v11 }
 0x1e2   :  { %2970 = vmatmul.mubr.f32.vlgmr.msra.gmra.mrb[2].mxu1 %v1863_v17 }
 0x1e3   :  { %2973 = vmatpush3.msra.mxu1 %v1425_v54  ;;  %2974 = vmatprep.mubr.msk.f32.mxu1 %vm3343_vm0, %v3344_v11 }
 0x1e4   :  { %2977 = vmatprep.subr.mxu1 %v3344_v11 }
 0x1ea   :  { %2975 = vmatmul.mubr.f32.vlgmr.msra.gmra.mrb[2].mxu1 %v1861_v48 }
 0x1eb   :  { %2978 = vmatpush3.msra.mxu1 %v3803_v13  ;;  %2979 = vmatprep.mubr.msk.f32.mxu1 %vm3343_vm0, %v3344_v11 }
 0x1f2   :  { %2980 = vmatmul.mubr.f32.vlgmr.msra.gmra.mrb[2].mxu1 %v1861_v48 }
 0x2a1   :  { %v1788_v49 = vpop.f32.mrb[2].mxu0 }
 0x2a2   :  { %v2951_v56 = vpop.f32.mrb[3].mxu0  ;;  %v2241_v25 = vsub.f32 %v3432_v18, %v1788_v49 }
 0x2c5   :  { %v2237_v33 = vpop.f32.mrb[2].mxu1 }
 0x2c6   :  { %v2242_v50 = vmul.f32 %v2241_v25, %v2237_v33  ;;  %v2981_v27 = vpop.f32.mrb[3].mxu1 }
 0x2c8   :  { %v2249_v28 = vmul.f32 %v2272_v26, %v2242_v50 }
 0x2ca   :  { %v2256_v11 = vadd.f32 %v2273_v60, %v2249_v28 }
 0x2cc   :  { %2257 = vst [vmem:[#allocation2] sm:$0xff] %v2256_v11 }
 0x2cd   :  { %3329 = shalt.err (!%p3326_p4)
}
 0x2ce   :  { %s3330_s9 = scalar_lea.hbm %s3868_s5, 128 }
 0x2cf   :  { %p3331_p5 = scmp.ne.s32.totalorder %s3868_s5, %s3330_s9  ;;  %p3334_p6 = scmp.lt.u32.totalorder %s3330_s9, %s3868_s5 }
 0x2d1   :  { %p3336_p7 = pnand %p3334_p6, %p3331_p5 }
 0x2d3   :  { %3339 = shalt.err (!%p3336_p7)
}
 0x2d4   :  { %2267 = dma.vmem_to_hbm [thread:$0]  %s2265_s6, 128, %s3868_s5, [#allocation3]  }
 0x2d5   :  { %3340 = dma.done.wait [#allocation3], 128  }
 0x2d6   :  { %3341 = vsyncadd [#allocation3], 4294967168 }
 0x2d7   :  { %2271 = vsyncpa [#allocation3], 1 }

// kernel: tpu_custom_call.1
= control target key start
LH: loop header
LB: loop body
LE: loop exit
PB: predicated region body
PF: predicated region fallthrough
CT: control target
= control target key end

     0   :  { %8 = vsyncpa [#allocation3], 0  ;;  %s351_s0 = inlined_call_operand.hbm [shape: f32[32,32], index: 0, kind: input, shape index: {}]   ;;  %s352_s1 = inlined_call_operand.vmem [shape: f32[1,32], index: 1, kind: input, shape index: {}]   ;;  %s353_s2 = inlined_call_operand.vmem [shape: f32[1,32], index: 2, kind: input, shape index: {}]   ;;  %s354_s3 = inlined_call_operand.hbm [shape: f32[32,32], index: 3, kind: output, shape index: {}]  }
   0x1   :  { %9 = vsyncpa [#allocation4], 0  ;;  %s239_s12 = smov [#allocation2]   ;;  %s191_s16 = scalar_lea.hbm %s351_s0, 512 }
   0x2   :  { %s15_s13 = sshll.u32 %s239_s12, 4  ;;  %p192_p0 = scmp.ne.s32.totalorder %s351_s0, %s191_s16  ;;  %s16_s13 = int_to_ptr.vmem [resolvable:$true] %s15_s13 }
   0x3   :  { %p195_p1 = scmp.lt.u32.totalorder %s191_s16, %s351_s0 }
   0x5   :  { %p197_p2 = pnand %p195_p1, %p192_p0 }
   0x7   :  { %200 = shalt.err (!%p197_p2)
}
   0x8   :  { %s201_s21 = scalar_lea.vmem %s16_s13, 512  ;;  %p206_p4 = scmp.lt.s32.totalorder %s16_s13, %s16_s13 }
   0x9   :  { %p202_p3 = scmp.ne.s32.totalorder %s16_s13, %s201_s21  ;;  %p207_p5 = scmp.lt.s32.totalorder %s201_s21, %s201_s21 }
   0xb   :  { %p208_p6 = por %p207_p5, %p206_p4 }
   0xd   :  { %p209_p7 = pnand %p208_p6, %p202_p3 }
   0xf   :  { %212 = shalt.err (!%p209_p7)
}
  0x10   :  { %s240_s22 = smov 128   ;;  %s241_s23 = smov 8  }
  0x11   :  { %21 = dma.hbm_to_vmem [thread:$0]  %s351_s0, 512, %s16_s13, [#allocation3], %s240_s22, %s240_s22, %s241_s23  }
  0x12   :  { %235 = dma.done.wait [#allocation3], 512  }
  0x13   :  { %236 = vsyncadd [#allocation3], 4294966784  ;;  %vm35_vm0 = vcmask 261120   ;;  %v278_v0 = vld [vmem:[#allocation2 + $0x10] sm:$0xff]  ;;  %v280_v1 = vld [vmem:[#allocation2] sm:$0xff] }
  0x14   :  { %v282_v2 = vld [vmem:[#allocation2 + $0x18] sm:$0xff]  ;;  %v42_v3 = vsel %vm35_vm0, %v278_v0, 0.0  ;;  %v36_v4 = vsel %vm35_vm0, %v280_v1, 0.0  ;;  %v288_v5 = vld [vmem:[#allocation2 + $0x8] sm:$0xff]  ;;  %v48_v9 = vmul.f32 %v280_v1, %v280_v1  ;;  %v50_v13 = vmul.f32 %v278_v0, %v278_v0 }
  0x15   :  { %43 = vadd.xlane.f32.xlu1 %v42_v3  ;;  %37 = vadd.xlane.f32.xlu0 %v36_v4  ;;  %v45_v6 = vsel %vm35_vm0, %v282_v2, 0.0  ;;  %v39_v7 = vsel %vm35_vm0, %v288_v5, 0.0  ;;  %v49_v8 = vmul.f32 %v288_v5, %v288_v5  ;;  %v51_v12 = vmul.f32 %v282_v2, %v282_v2 }
  0x16   :  { %v52_v11 = vsel %vm35_vm0, %v48_v9, 0.0  ;;  %v58_v15 = vsel %vm35_vm0, %v50_v13, 0.0 }
  0x17   :  { %v55_v10 = vsel %vm35_vm0, %v49_v8, 0.0  ;;  %v61_v14 = vsel %vm35_vm0, %v51_v12, 0.0 }
  0x19   :  { %46 = vadd.xlane.f32.xlu1 %v45_v6  ;;  %40 = vadd.xlane.f32.xlu0 %v39_v7 }
  0x1d   :  { %56 = vadd.xlane.f32.xlu1 %v55_v10  ;;  %53 = vadd.xlane.f32.xlu0 %v52_v11  ;;  %v169_v11 = vld [vmem:[%s352_s1] ss:$0 sm:$0xff]  ;;  %s242_s1 = smov [#allocation5]  }
  0x21   :  { %62 = vadd.xlane.f32.xlu1 %v61_v14  ;;  %59 = vadd.xlane.f32.xlu0 %v58_v15  ;;  %v170_v14 = vld [vmem:[%s353_s2] ss:$0 sm:$0xff]  ;;  %s157_s2 = sshll.u32 %s242_s1, 4  ;;  %s158_s2 = int_to_ptr.vmem [resolvable:$true] %s157_s2 }
  0x22   :  { %s213_s29 = scalar_lea.vmem %s158_s2, 512  ;;  %p218_p9 = scmp.lt.s32.totalorder %s158_s2, %s158_s2 }
  0x23   :  { %p214_p8 = scmp.ne.s32.totalorder %s158_s2, %s213_s29  ;;  %p219_p10 = scmp.lt.s32.totalorder %s213_s29, %s213_s29 }
  0x25   :  { %p220_p11 = por %p219_p10, %p218_p9 }
  0x27   :  { %p221_p12 = pnand %p220_p11, %p214_p8 }
  0xa2   :  { %v44_v16 = vpop.xlane.xlu1 %43  ;;  %v38_v17 = vpop.xlane.xlu0 %37 }
  0xa3   :  { %v306_v18 = vmul.f32 0.03125, %v38_v17  ;;  %v310_v22 = vmul.f32 0.03125, %v44_v16 }
  0xa5   :  { %v68_v23 = vmul.f32 %v306_v18, %v38_v17  ;;  %v70_v30 = vmul.f32 %v310_v22, %v44_v16  ;;  %v120_v10 = vsub.f32 %v280_v1, %v306_v18  ;;  %v122_v1 = vsub.f32 %v278_v0, %v310_v22 }
  0xa6   :  { %v47_v19 = vpop.xlane.xlu1 %46  ;;  %v41_v20 = vpop.xlane.xlu0 %40 }
  0xa7   :  { %v308_v21 = vmul.f32 0.03125, %v41_v20  ;;  %v313_v24 = vmul.f32 0.03125, %v47_v19 }
  0xa9   :  { %v69_v25 = vmul.f32 %v308_v21, %v41_v20  ;;  %v71_v31 = vmul.f32 %v313_v24, %v47_v19  ;;  %v121_v8 = vsub.f32 %v288_v5, %v308_v21  ;;  %v123_v5 = vsub.f32 %v282_v2, %v313_v24 }
  0xaa   :  { %v57_v26 = vpop.xlane.xlu1 %56  ;;  %v54_v27 = vpop.xlane.xlu0 %53 }
  0xab   :  { %v73_v28 = vsub.f32 %v57_v26, %v69_v25  ;;  %v72_v29 = vsub.f32 %v54_v27, %v68_v23 }
  0xad   :  { %v77_v32 = vmax.f32 %v73_v28, 0.0  ;;  %v76_v33 = vmax.f32 %v72_v29, 0.0 }
  0xae   :  { %v63_v34 = vpop.xlane.xlu1 %62  ;;  %v60_v35 = vpop.xlane.xlu0 %59 }
  0xaf   :  { %v81_v36 = vmul.f32 0.032258064, %v77_v32  ;;  %v80_v37 = vmul.f32 0.032258064, %v76_v33  ;;  %v75_v38 = vsub.f32 %v63_v34, %v71_v31  ;;  %v74_v39 = vsub.f32 %v60_v35, %v70_v30 }
  0xb1   :  { %175 = vrsqrt.f32 %v81_v36  ;;  %v79_v40 = vmax.f32 %v75_v38, 0.0  ;;  %v78_v41 = vmax.f32 %v74_v39, 0.0  ;;  %vm93_vm1 = vcmp.eq.f32.partialorder %v81_v36, inf }
  0xb2   :  { %177 = vrsqrt.f32 %v80_v37  ;;  %v96_v47 = vand.u32 2147483648, %v81_v36  ;;  %vm95_vm2 = vcmp.eq.f32.partialorder %v81_v36, 0.0  ;;  %vm86_vm3 = vcmp.eq.f32.partialorder %v80_v37, inf }
  0xb3   :  { %v83_v42 = vmul.f32 0.032258064, %v79_v40  ;;  %v82_v43 = vmul.f32 0.032258064, %v78_v41  ;;  %v89_v50 = vand.u32 2147483648, %v80_v37  ;;  %vm88_vm4 = vcmp.eq.f32.partialorder %v80_v37, 0.0 }
  0xb5   :  { %179 = vrsqrt.f32 %v83_v42  ;;  %vm107_vm5 = vcmp.eq.f32.partialorder %v83_v42, inf  ;;  %v110_v59 = vand.u32 2147483648, %v83_v42  ;;  %vm109_vm6 = vcmp.eq.f32.partialorder %v83_v42, 0.0 }
  0xb6   :  { %181 = vrsqrt.f32 %v82_v43  ;;  %vm100_vm7 = vcmp.eq.f32.partialorder %v82_v43, inf  ;;  %v103_v62 = vand.u32 2147483648, %v82_v43  ;;  %vm102_vm8 = vcmp.eq.f32.partialorder %v82_v43, 0.0 }
  0xbb   :  { %v176_v44 = vpop.eup %175 }
  0xbc   :  { %v178_v45 = vpop.eup %177  ;;  %v92_v46 = vmul.f32 %v176_v44, %v81_v36 }
  0xbd   :  { %v85_v48 = vmul.f32 %v178_v45, %v80_v37 }
  0xbe   :  { %v94_v49 = vsel %vm93_vm1, %v81_v36, %v92_v46 }
  0xbf   :  { %v97_v51 = vsel %vm95_vm2, %v96_v47, %v94_v49  ;;  %v87_v52 = vsel %vm86_vm3, %v80_v37, %v85_v48  ;;  %v180_v55 = vpop.eup %179 }
  0xc0   :  { %v113_v53 = vadd.f32 1e-06, %v97_v51  ;;  %v90_v54 = vsel %vm88_vm4, %v89_v50, %v87_v52  ;;  %v182_v57 = vpop.eup %181  ;;  %v106_v58 = vmul.f32 %v180_v55, %v83_v42 }
  0xc1   :  { %v112_v56 = vadd.f32 1e-06, %v90_v54  ;;  %v99_v60 = vmul.f32 %v182_v57, %v82_v43 }
  0xc2   :  { %183 = vrcp.f32 %v113_v53  ;;  %v108_v61 = vsel %vm107_vm5, %v83_v42, %v106_v58 }
  0xc3   :  { %185 = vrcp.f32 %v112_v56  ;;  %v111_v63 = vsel %vm109_vm6, %v110_v59, %v108_v61  ;;  %v101_v3 = vsel %vm100_vm7, %v82_v43, %v99_v60 }
  0xc4   :  { %v115_v4 = vadd.f32 1e-06, %v111_v63  ;;  %v104_v6 = vsel %vm102_vm8, %v103_v62, %v101_v3 }
  0xc5   :  { %v114_v7 = vadd.f32 1e-06, %v104_v6 }
  0xc6   :  { %187 = vrcp.f32 %v115_v4 }
  0xc7   :  { %189 = vrcp.f32 %v114_v7 }
  0xcc   :  { %v184_v9 = vpop.eup %183 }
  0xcd   :  { %v186_v12 = vpop.eup %185  ;;  %v125_v13 = vmul.f32 %v184_v9, %v121_v8 }
  0xce   :  { %v124_v15 = vmul.f32 %v186_v12, %v120_v10 }
  0xcf   :  { %v135_v16 = vmul.f32 %v169_v11, %v125_v13 }
  0xd0   :  { %v134_v17 = vmul.f32 %v169_v11, %v124_v15  ;;  %v188_v20 = vpop.eup %187 }
  0xd1   :  { %v145_v19 = vadd.f32 %v170_v14, %v135_v16  ;;  %v190_v21 = vpop.eup %189  ;;  %v127_v23 = vmul.f32 %v188_v20, %v123_v5 }
  0xd2   :  { %v144_v18 = vadd.f32 %v170_v14, %v134_v17  ;;  %v126_v25 = vmul.f32 %v190_v21, %v122_v1 }
  0xd3   :  { %149 = vst.msk [vmem:[#allocation5 + $0x8] sm:$0xff] %vm35_vm0, %v145_v19  ;;  %v137_v26 = vmul.f32 %v169_v11, %v127_v23 }
  0xd4   :  { %148 = vst.msk [vmem:[#allocation5] sm:$0xff] %vm35_vm0, %v144_v18  ;;  %v136_v27 = vmul.f32 %v169_v11, %v126_v25 }
  0xd5   :  { %v147_v28 = vadd.f32 %v170_v14, %v137_v26 }
  0xd6   :  { %v146_v29 = vadd.f32 %v170_v14, %v136_v27 }
  0xd7   :  { %151 = vst.msk [vmem:[#allocation5 + $0x18] sm:$0xff] %vm35_vm0, %v147_v28 }
  0xd8   :  { %150 = vst.msk [vmem:[#allocation5 + $0x10] sm:$0xff] %vm35_vm0, %v146_v29 }
  0xd9   :  { %224 = shalt.err (!%p221_p12)
}
  0xda   :  { %s225_s5 = scalar_lea.hbm %s354_s3, 512 }
  0xdb   :  { %p226_p13 = scmp.ne.s32.totalorder %s354_s3, %s225_s5  ;;  %p229_p0 = scmp.lt.u32.totalorder %s225_s5, %s354_s3 }
  0xdd   :  { %p231_p1 = pnand %p229_p0, %p226_p13 }
  0xdf   :  { %234 = shalt.err (!%p231_p1)
}
  0xe0   :  { %163 = dma.vmem_to_hbm [thread:$0]  %s158_s2, 512, %s354_s3, [#allocation4], %s240_s22, %s240_s22, %s241_s23  }
  0xe1   :  { %237 = dma.done.wait [#allocation4], 512  }
  0xe2   :  { %238 = vsyncadd [#allocation4], 4294966784 }
  0xe3   :  { %167 = vsyncpa [#allocation3], 1 }
  0xe4   :  { %168 = vsyncpa [#allocation4], 1 }

</bundles_post_ra>
